<compile_context>
chip_gen: v6e
topology: v6e:2x2x1
jax: 0.10.0
libtpu: 0.0.40
codegen_flags: <defaults>
</compile_context>

<pallas_src>
import functools

import jax
import jax.numpy as jnp
from jax.experimental import pallas as pl
from jax.experimental.pallas import tpu as pltpu


def _round_up(x, m):
    return (x + m - 1) // m * m


def _vmem_capacity_bytes():
    # Trace-time hardware query; fall back to the v5e/v6e physical size if the
    # query is unavailable on this backend.
    try:
        return int(pltpu.get_tpu_info().vmem_capacity_bytes)
    except Exception:
        return 128 * 1024 * 1024


def _nca_kernel(sim_ref, tgt_ref, out_ref, acc_ref, *, scale, true_b, block_rows):
    # sim_ref: (TB, C) in VMEM (native dtype); tgt_ref: (TB, 1) int32;
    # out_ref: (1, 8, 128) f32 resident block (one per shard);
    # acc_ref: (1,) f32 SMEM scalar accumulator.
    p = pl.program_id(0)        # shard axis
    j = pl.program_id(1)        # batch-tile index within shard (reduction axis)
    n_j = pl.num_programs(1)

    @pl.when(j == 0)
    def _():
        acc_ref[0] = 0.0

    s = sim_ref[...].astype(jnp.float32)
    if scale != 1.0:                       # compile-time constant; skip when 1.0
        s = s * scale
    s = s - jnp.max(s, axis=1, keepdims=True)       # per-row max over classes

    col_ids = jax.lax.broadcasted_iota(jnp.int32, s.shape, 1)   # (TB, C)
    pos_mask = col_ids == tgt_ref[...]                          # one-hot targets

    # numerator_i = s[i, targets[i]]
    numerator = jnp.sum(jnp.where(pos_mask, s, 0.0), axis=1, keepdims=True)

    # Fused denominator: the target entry contributes exp(0)=1 instead of exp(s).
    exp_sum = jnp.sum(jnp.exp(s), axis=1, keepdims=True)
    denom_sum = exp_sum - jnp.exp(numerator) + 1.0

    losses = jnp.log(denom_sum) - numerator          # = -(num - log(sum exp denom))

    # Mask rows beyond the true batch (padding added by the wrapper).
    row0 = (p * n_j + j) * block_rows
    row_ids = row0 + jax.lax.broadcasted_iota(jnp.int32, losses.shape, 0)
    losses = jnp.where(row_ids < true_b, losses, 0.0)

    # Scalar accumulate in SMEM; write the lane-dense output block once.
    acc_ref[0] += jnp.sum(losses)

    @pl.when(j == n_j - 1)
    def _():
        out_ref[...] = jnp.full(out_ref.shape, acc_ref[0], dtype=jnp.float32)


def nca_loss_pallas(similarities, targets, *, scale=1.0, margin=0.0,
                    block_rows=None, num_parallel=None, cast_to_bf16=False):
    assert margin == 0.0, "margin > 0 branch not supported (see TODO above)"
    B, C = similarities.shape

    sim = similarities                              # keep native dtype by default
    if cast_to_bf16 and sim.dtype == jnp.float32:
        sim = sim.astype(jnp.bfloat16)              # halve HBM traffic; math stays f32
    itemsize = jnp.dtype(sim.dtype).itemsize

    # Generation-aware VMEM budget: ~60% of physical VMEM, capped at 48 MiB
    # (v5e/v6e: 48 MiB of 128 MiB; v7x: ~38 MiB of 64 MiB).
    vmem_cap = _vmem_capacity_bytes()
    vmem_limit = max(16 * 1024 * 1024, min(48 * 1024 * 1024, int(0.6 * vmem_cap)))

    # Batch-tile size from the f32-expanded working set:
    #   2 * itemsize  -> double-buffered native-dtype input
    #   ~16 B/elem    -> in-kernel f32/int32 temporaries (s, exp(s), iota, mask)
    # No row cap beyond the batch itself; rows are a multiple of 8 for sublanes.
    if block_rows is None:
        budget = int(0.75 * vmem_limit)
        per_row_bytes = C * (2 * itemsize + 16)
        tb = budget // max(1, per_row_bytes)
        tb = max(8, (tb // 8) * 8)
    else:
        tb = max(8, _round_up(block_rows, 8))
    tb = min(tb, _round_up(B, 8))

    num_tiles = -(-B // tb)
    if num_parallel is None:
        # Default to 1: on single-TC v5e/v6e the shard axis is pure overhead and
        # can pad the grid by a whole extra tile of HBM traffic.  Pass 2 on
        # multi-TensorCore parts (v7x) to engage both cores.
        num_parallel = 1
    P = max(1, int(num_parallel))
    P = min(P, num_tiles)
    T = -(-num_tiles // P)                          # batch tiles per shard
    B_pad = P * T * tb

    tgt = targets.reshape(B).astype(jnp.int32)
    if B_pad != B:
        sim = jnp.pad(sim, ((0, B_pad - B), (0, 0)))
        tgt = jnp.pad(tgt, (0, B_pad - B))
    tgt = tgt.reshape(B_pad, 1)

    out = pl.pallas_call(
        functools.partial(_nca_kernel, scale=float(scale), true_b=B,
                          block_rows=tb),
        out_shape=jax.ShapeDtypeStruct((P, 8, 128), jnp.float32),
        grid=(P, T),
        in_specs=[
            pl.BlockSpec((tb, C), lambda p, j: (p * T + j, 0)),
            pl.BlockSpec((tb, 1), lambda p, j: (p * T + j, 0)),
        ],
        out_specs=pl.BlockSpec((1, 8, 128), lambda p, j: (p, 0, 0)),
        scratch_shapes=[pltpu.SMEM((1,), jnp.float32)],
        compiler_params=pltpu.CompilerParams(
            dimension_semantics=("parallel", "arbitrary"),
            vmem_limit_bytes=vmem_limit,
        ),
    )(sim, tgt)

    return jnp.sum(out[:, 0, 0]) / B


def nca_loss_ref(similarities, targets, *, scale=1.0):
    # Pure-JAX reference mirroring the PyTorch code (margin=0 path).
    s = scale * similarities.astype(jnp.float32)
    s = s - jnp.max(s, axis=1, keepdims=True)
    B = s.shape[0]
    numerator = s[jnp.arange(B), targets]
    denom = s.at[jnp.arange(B), targets].set(0.0)
    losses = numerator - jnp.log(jnp.sum(jnp.exp(denom), axis=-1))
    return jnp.mean(-losses)


if __name__ == "__main__":
    key = jax.random.PRNGKey(0)

    # Small demo shapes consistent with the module: 8 samples, 32 classes.
    k_sim, k_tgt = jax.random.split(key)
    B, C = 8, 32
    similarities = jax.random.normal(k_sim, (B, C), dtype=jnp.float32)
    targets = jax.random.randint(k_tgt, (B,), 0, C, dtype=jnp.int32)

    loss = jax.block_until_ready(
        nca_loss_pallas(similarities, targets, scale=1.0, margin=0.0))
    ref = jax.block_until_ready(nca_loss_ref(similarities, targets, scale=1.0))
    assert jnp.allclose(loss, ref, rtol=1e-5, atol=1e-5), (loss, ref)

    # Exercise multi-tile batch, explicit 2-shard path, padding mask (B not a
    # multiple of the tile size), and the bf16 no-wrapper-upcast input path.
    k2_sim, k2_tgt = jax.random.split(jax.random.PRNGKey(0), 2)
    B2, C2 = 300, 128
    sim2 = jax.random.normal(k2_sim, (B2, C2), dtype=jnp.float32).astype(jnp.bfloat16)
    tgt2 = jax.random.randint(k2_tgt, (B2,), 0, C2, dtype=jnp.int32)

    loss2 = jax.block_until_ready(
        nca_loss_pallas(sim2, tgt2, scale=2.0, margin=0.0,
                        block_rows=64, num_parallel=2))
    ref2 = jax.block_until_ready(nca_loss_ref(sim2, tgt2, scale=2.0))
    assert jnp.allclose(loss2, ref2, rtol=1e-5, atol=1e-5), (loss2, ref2)

    # Auto tile-size path (working-set-based, no row cap), f32 inputs.
    loss3 = jax.block_until_ready(
        nca_loss_pallas(sim2.astype(jnp.float32), tgt2, scale=2.0, margin=0.0))
    assert jnp.allclose(loss3, ref2, rtol=1e-3, atol=1e-3), (loss3, ref2)

    print("KERNEL_OK")
</pallas_src>

<mosaic_0001>
module attributes {stable_mosaic.version = 11 : i64} {
  func.func @_nca_kernel(%arg0: i32, %arg1: i32, %arg2: memref<8x32xf32, #tpu.memory_space<vmem>>, %arg3: memref<8x1xi32, #tpu.memory_space<vmem>>, %arg4: memref<1x8x128xf32, #tpu.memory_space<vmem>>, %arg5: memref<1xf32, #tpu.memory_space<smem>>) attributes {dimension_semantics = [#tpu.dimension_semantics<parallel>, #tpu.dimension_semantics<arbitrary>], iteration_bounds = array<i64: 1, 1>, scalar_prefetch = 0 : i64, scratch_operands = 1 : i64, tpu.core_type = #tpu.core_type<tc>, window_params = [{transform_indices = @transform_0, window_bounds = array<i64: 8, 32>}, {transform_indices = @transform_1, window_bounds = array<i64: 8, 1>}, {transform_indices = @transform_2, window_bounds = array<i64: 1, 8, 128>}]} {
    %c0_i32 = arith.constant 0 : i32
    %0 = arith.cmpi eq, %arg1, %c0_i32 : i32
    %1 = arith.extui %0 : i1 to i32
    %c0_i32_0 = arith.constant 0 : i32
    %2 = arith.cmpi ne, %1, %c0_i32_0 : i32
    scf.if %2 {
      %cst_15 = arith.constant 0.000000e+00 : f32
      %c0_16 = arith.constant 0 : index
      %45 = memref.load %arg5[%c0_16] : memref<1xf32, #tpu.memory_space<smem>>
      memref.store %cst_15, %arg5[%c0_16] : memref<1xf32, #tpu.memory_space<smem>>
    } else {
    }
    %c0 = arith.constant 0 : index
    %c0_1 = arith.constant 0 : index
    %3 = vector.load %arg2[%c0, %c0_1] : memref<8x32xf32, #tpu.memory_space<vmem>>, vector<8x32xf32>
    %cst = arith.constant dense<0xFF800000> : vector<8xf32>
    %4 = vector.multi_reduction <maximumf>, %3, %cst [1] : vector<8x32xf32> to vector<8xf32>
    %5 = vector.shape_cast %4 : vector<8xf32> to vector<8x1xf32>
    %6 = vector.broadcast %5 : vector<8x1xf32> to vector<8x32xf32>
    %7 = arith.subf %3, %6 : vector<8x32xf32>
    %8 = tpu.iota {dimensions = array<i32: 1>} : vector<8x32xi32>
    %c0_2 = arith.constant 0 : index
    %c0_3 = arith.constant 0 : index
    %9 = vector.load %arg3[%c0_2, %c0_3] : memref<8x1xi32, #tpu.memory_space<vmem>>, vector<8x1xi32>
    %10 = vector.broadcast %9 : vector<8x1xi32> to vector<8x32xi32>
    %11 = arith.cmpi eq, %8, %10 : vector<8x32xi32>
    %cst_4 = arith.constant 0.000000e+00 : f32
    %12 = vector.broadcast %cst_4 : f32 to vector<8x32xf32>
    %13 = arith.select %11, %7, %12 : vector<8x32xi1>, vector<8x32xf32>
    %cst_5 = arith.constant dense<0.000000e+00> : vector<8xf32>
    %14 = vector.multi_reduction <add>, %13, %cst_5 [1] : vector<8x32xf32> to vector<8xf32>
    %15 = vector.shape_cast %14 : vector<8xf32> to vector<8x1xf32>
    %16 = math.exp %7 : vector<8x32xf32>
    %cst_6 = arith.constant dense<0.000000e+00> : vector<8xf32>
    %17 = vector.multi_reduction <add>, %16, %cst_6 [1] : vector<8x32xf32> to vector<8xf32>
    %18 = vector.shape_cast %17 : vector<8xf32> to vector<8x1xf32>
    %19 = math.exp %15 : vector<8x1xf32>
    %20 = arith.subf %18, %19 : vector<8x1xf32>
    %cst_7 = arith.constant 1.000000e+00 : f32
    %21 = vector.broadcast %cst_7 : f32 to vector<8x1xf32>
    %22 = arith.addf %20, %21 : vector<8x1xf32>
    %23 = math.log %22 : vector<8x1xf32>
    %24 = arith.subf %23, %15 : vector<8x1xf32>
    %c1_i32 = arith.constant 1 : i32
    %25 = arith.muli %arg0, %c1_i32 : i32
    %26 = arith.addi %25, %arg1 : i32
    %c8_i32 = arith.constant 8 : i32
    %27 = arith.muli %26, %c8_i32 : i32
    %28 = tpu.iota {dimensions = array<i32: 0>} : vector<8x1xi32>
    %29 = vector.broadcast %27 : i32 to vector<8x1xi32>
    %30 = arith.addi %29, %28 : vector<8x1xi32>
    %c8_i32_8 = arith.constant 8 : i32
    %31 = vector.broadcast %c8_i32_8 : i32 to vector<8x1xi32>
    %32 = arith.cmpi slt, %30, %31 : vector<8x1xi32>
    %cst_9 = arith.constant 0.000000e+00 : f32
    %33 = vector.broadcast %cst_9 : f32 to vector<8x1xf32>
    %34 = arith.select %32, %24, %33 : vector<8x1xi1>, vector<8x1xf32>
    %c0_10 = arith.constant 0 : index
    %35 = memref.load %arg5[%c0_10] : memref<1xf32, #tpu.memory_space<smem>>
    %36 = vector.shape_cast %34 : vector<8x1xf32> to vector<1x8x1xf32>
    %cst_11 = arith.constant dense<0.000000e+00> : vector<1xf32>
    %37 = vector.multi_reduction <add>, %36, %cst_11 [1, 2] : vector<1x8x1xf32> to vector<1xf32>
    %38 = vector.shape_cast %37 : vector<1xf32> to vector<1x1x1xf32>
    %39 = vector.extract %38[0, 0, 0] : f32 from vector<1x1x1xf32>
    %40 = arith.addf %35, %39 : f32
    %c0_12 = arith.constant 0 : index
    %41 = memref.load %arg5[%c0_12] : memref<1xf32, #tpu.memory_space<smem>>
    memref.store %40, %arg5[%c0_12] : memref<1xf32, #tpu.memory_space<smem>>
    %c0_i32_13 = arith.constant 0 : i32
    %42 = arith.cmpi eq, %arg1, %c0_i32_13 : i32
    %43 = arith.extui %42 : i1 to i32
    %c0_i32_14 = arith.constant 0 : i32
    %44 = arith.cmpi ne, %43, %c0_i32_14 : i32
    scf.if %44 {
      %c0_15 = arith.constant 0 : index
      %45 = memref.load %arg5[%c0_15] : memref<1xf32, #tpu.memory_space<smem>>
      %46 = vector.broadcast %45 : f32 to vector<1x8x128xf32>
      %c0_16 = arith.constant 0 : index
      %c0_17 = arith.constant 0 : index
      %c0_18 = arith.constant 0 : index
      %47 = vector.load %arg4[%c0_16, %c0_17, %c0_18] : memref<1x8x128xf32, #tpu.memory_space<vmem>>, vector<1x8x128xf32>
      tpu.vector_store %arg4[%c0_16, %c0_17, %c0_18], %46 {strides = array<i32>} : memref<1x8x128xf32, #tpu.memory_space<vmem>>, vector<1x8x128xf32>,
    } else {
    }
    return
  }
  func.func @transform_0(%arg0: i32, %arg1: i32) -> (i32, i32) {
    %c1_i32 = arith.constant 1 : i32
    %0 = arith.muli %arg0, %c1_i32 : i32
    %1 = arith.addi %0, %arg1 : i32
    %c0_i32 = arith.constant 0 : i32
    %c0_i32_0 = arith.constant 0 : i32
    return %1, %c0_i32 : i32, i32
  }
  func.func @transform_1(%arg0: i32, %arg1: i32) -> (i32, i32) {
    %c1_i32 = arith.constant 1 : i32
    %0 = arith.muli %arg0, %c1_i32 : i32
    %1 = arith.addi %0, %arg1 : i32
    %c0_i32 = arith.constant 0 : i32
    %c0_i32_0 = arith.constant 0 : i32
    return %1, %c0_i32 : i32, i32
  }
  func.func @transform_2(%arg0: i32, %arg1: i32) -> (i32, i32, i32) {
    %c0_i32 = arith.constant 0 : i32
    %c0_i32_0 = arith.constant 0 : i32
    %c0_i32_1 = arith.constant 0 : i32
    return %arg0, %c0_i32, %c0_i32_0 : i32, i32, i32
  }
}

</mosaic_0001>

<bundles_post_ra>
// kernel: tpu_custom_call.1
= control target key start
LH: loop header
LB: loop body
LE: loop exit
PB: predicated region body
PF: predicated region fallthrough
CT: control target
= control target key end

     0   :  { %vm53_vm0 = vcmask 261120   ;;  %s198_s0 = inlined_call_operand.vmem [shape: f32[8,32], index: 0, kind: input, shape index: {}]   ;;  %s199_s1 = inlined_call_operand.vmem [shape: s32[8,1], index: 1, kind: input, shape index: {}]   ;;  %s200_s2 = inlined_call_operand.hbm [shape: f32[1,8,128], index: 2, kind: output, shape index: {}]  }
   0x1   :  { %v52_v0 = vld [vmem:[%s198_s0] sm:$0xff] }
   0x2   :  { %7 = vsyncpa [#allocation4], 0  ;;  %v54_v1 = vsel %vm53_vm0, %v52_v0, -inf  ;;  %v169_v2 = vmov 0   ;;  %v60_v3 = vld [vmem:[%s199_s1] sm:$0xff]  ;;  %v58_v6 = vlaneseq  ;;  %vm90_vm2 = vcmask 7168  }
   0x3   :  { %140 = vset.pattern.permute.xlu0 %v169_v2  ;;  %s170_s0 = smov [#allocation3]  }
   0x4   :  { %55 = vmax.xlane.f32.xlu0 %v54_v1  ;;  %v59_v8 = vand.u32 127, %v58_v6  ;;  %s116_s1 = sshll.u32 %s170_s0, 4  ;;  %s117_s1 = int_to_ptr.vmem [resolvable:$true] %s116_s1 }
   0x5   :  { %s147_s14 = scalar_lea.vmem %s117_s1, 128  ;;  %p152_p1 = scmp.lt.s32.totalorder %s117_s1, %s117_s1 }
   0x6   :  { %p148_p0 = scmp.ne.s32.totalorder %s117_s1, %s147_s14  ;;  %p153_p2 = scmp.lt.s32.totalorder %s147_s14, %s147_s14 }
   0x8   :  { %p154_p3 = por %p153_p2, %p152_p1 }
   0xa   :  { %p155_p4 = pnand %p154_p3, %p148_p0 }
  0x1a   :  { %62 = vperm.xlu0 %140, %v60_v3  }
  0x8d   :  { %v56_v4 = vpop.xlane.xlu0 %55 }
  0x8e   :  { %v57_v5 = vsub.f32 %v52_v0, %v56_v4 }
  0x90   :  { %v69_v7 = vmul.f32 1.442695, %v57_v5 }
  0x92   :  { %141 = vpow2.f32 %v69_v7 }
  0x95   :  { %v63_v9 = vpop.permute.xlu0 %62 }
  0x96   :  { %vm64_vm1 = vcmp.eq.s32.totalorder %v59_v8, %v63_v9 }
  0x97   :  { %v65_v10 = vsel %vm64_vm1, %v57_v5, 0.0 }
  0x98   :  { %v66_v11 = vsel %vm53_vm0, %v65_v10, 0.0 }
  0x99   :  { %67 = vadd.xlane.f32.xlu1 %v66_v11 }
  0x9f   :  { %v142_v12 = vpop.eup %141 }
  0xa0   :  { %v71_v13 = vsel %vm53_vm0, %v142_v12, 0.0 }
  0xa1   :  { %72 = vadd.xlane.f32.xlu1 %v71_v13 }
 0x122   :  { %v68_v14 = vpop.xlane.xlu1 %67 }
 0x123   :  { %v74_v15 = vmul.f32 1.442695, %v68_v14 }
 0x125   :  { %143 = vpow2.f32 %v74_v15 }
 0x12a   :  { %v73_v17 = vpop.xlane.xlu1 %72 }
 0x132   :  { %v144_v16 = vpop.eup %143 }
 0x133   :  { %v76_v18 = vsub.f32 %v73_v17, %v144_v16 }
 0x135   :  { %v77_v19 = vadd.f32 1.0, %v76_v18 }
 0x137   :  { %145 = vlog2.f32 %v77_v19 }
 0x144   :  { %v146_v20 = vpop.eup %145 }
 0x145   :  { %v79_v21 = vmul.f32 0.6931472, %v146_v20 }
 0x147   :  { %v80_v22 = vsub.f32 %v79_v21, %v68_v14 }
 0x149   :  { %v91_v23 = vsel %vm90_vm2, %v80_v22, 0.0 }
 0x14a   :  { %92 = vadd.xlane.f32.xlu1 %v91_v23 }
 0x1d3   :  { %v93_v24 = vpop.xlane.xlu1 %92 }
 0x1d4   :  { %v94_v25 = vrot.slane %v93_v24, 4 }
 0x1d6   :  { %v95_v26 = vadd.f32 %v94_v25, %v93_v24 }
 0x1d8   :  { %v96_v27 = vrot.slane %v95_v26, 2 }
 0x1da   :  { %v97_v28 = vadd.f32 %v96_v27, %v95_v26 }
 0x1dc   :  { %v98_v29 = vrot.slane %v97_v28, 1 }
 0x1de   :  { %v99_v30 = vadd.f32 %v98_v29, %v97_v28 }
 0x1e0   :  { %136 = vpush %v99_v30 }
 0x211   :  { %s137_s13 = spop %136 }
 0x212   :  { %v108_v31 = vstv %s137_s13 }
 0x213   :  { %109 = vst [vmem:[#allocation3] sm:$0xff] %v108_v31 }
 0x214   :  { %158 = shalt.err (!%p155_p4)
}
 0x215   :  { %119 = dma.vmem_to_hbm [thread:$0]  %s117_s1, 128, %s200_s2, [#allocation4]  }
 0x216   :  { %167 = dma.done.wait [#allocation4], 128  }
 0x217   :  { %168 = vsyncadd [#allocation4], 4294967168 }
 0x218   :  { %123 = vsyncpa [#allocation4], 1 }

</bundles_post_ra>
